<compile_context>
chip_gen: v6e
topology: v6e:2x2x1
jax: 0.10.0
libtpu: 0.0.40
codegen_flags: <defaults>
</compile_context>

<pallas_src>
import math

import jax
import jax.numpy as jnp
from jax.experimental import pallas as pl
from jax.experimental.pallas import tpu as pltpu


# ---------------------------------------------------------------------------
# Pallas kernel: copy both embedding tables HBM -> HBM via two async DMAs.
# Refs arrive as raw HBM refs (memory_space=pl.ANY), so no VMEM staging.
# ---------------------------------------------------------------------------
def _dma_copy_kernel(user_in, item_in, user_out, item_out, sem):
    cp_user = pltpu.make_async_copy(user_in, user_out, sem.at[0])
    cp_item = pltpu.make_async_copy(item_in, item_out, sem.at[1])
    # Issue both DMAs, then wait: the two transfers overlap on the DMA engine.
    cp_user.start()
    cp_item.start()
    cp_user.wait()
    cp_item.wait()


def _materialized_copy(user_emb: jax.Array, item_emb: jax.Array):
    """One fused pallas_call that produces fresh copies of both tables."""
    bytes_moved = 2 * (user_emb.size * user_emb.dtype.itemsize
                       + item_emb.size * item_emb.dtype.itemsize)
    return pl.pallas_call(
        _dma_copy_kernel,
        out_shape=(
            jax.ShapeDtypeStruct(user_emb.shape, user_emb.dtype),
            jax.ShapeDtypeStruct(item_emb.shape, item_emb.dtype),
        ),
        in_specs=[
            pl.BlockSpec(memory_space=pl.ANY),
            pl.BlockSpec(memory_space=pl.ANY),
        ],
        out_specs=(
            pl.BlockSpec(memory_space=pl.ANY),
            pl.BlockSpec(memory_space=pl.ANY),
        ),
        scratch_shapes=[pltpu.SemaphoreType.DMA((2,))],
        cost_estimate=pl.CostEstimate(
            flops=0, transcendentals=0, bytes_accessed=bytes_moved),
    )(user_emb, item_emb)


def mf_forward(user_emb: jax.Array, item_emb: jax.Array, materialize: bool = True):
    """Pallas implementation of Matrix_Factorization.forward().

    materialize=False: production fast path -- the forward is an identity over
    the parameter tables, so return them directly (no HBM traffic, no launch).

    materialize=True: stream both tables through a single HBM->HBM DMA kernel,
    producing fresh output buffers with identical values (exercises Pallas).
    """
    if not materialize:
        return user_emb, item_emb
    return _materialized_copy(user_emb, item_emb)


def xavier_uniform(key, shape, dtype=jnp.float32):
    """Deterministic nn.init.xavier_uniform_ equivalent (gain=1)."""
    fan_out, fan_in = shape  # torch (num, emb) tensor: fan_in=emb, fan_out=num
    limit = math.sqrt(6.0 / (fan_in + fan_out))
    return jax.random.uniform(key, shape, dtype=dtype, minval=-limit, maxval=limit)


if __name__ == "__main__":
    # Small synthetic sizes consistent with the module: data.user_num,
    # data.item_num, emb_size.
    user_num, item_num, emb_size = 8, 16, 32

    key = jax.random.PRNGKey(0)
    k_user, k_item = jax.random.split(key)
    user_emb = xavier_uniform(k_user, (user_num, emb_size))
    item_emb = xavier_uniform(k_item, (item_num, emb_size))

    # Run the fused Pallas DMA-copy kernel once.
    u_out, i_out = mf_forward(user_emb, item_emb, materialize=True)
    jax.block_until_ready((u_out, i_out))

    # Verify forward semantics: returns the parameter tables unchanged.
    assert u_out.shape == (user_num, emb_size) and u_out.dtype == user_emb.dtype
    assert i_out.shape == (item_num, emb_size) and i_out.dtype == item_emb.dtype
    assert bool(jnp.array_equal(u_out, user_emb))
    assert bool(jnp.array_equal(i_out, item_emb))

    # Zero-copy fast path (what real deployments of this module should use).
    u_fast, i_fast = mf_forward(user_emb, item_emb, materialize=False)
    assert u_fast is user_emb and i_fast is item_emb

    print("KERNEL_OK")
</pallas_src>

<mosaic_0001>
module attributes {stable_mosaic.version = 11 : i64} {
  func.func @_dma_copy_kernel(%arg0: memref<8x32xf32, #tpu.memory_space<any>>, %arg1: memref<16x32xf32, #tpu.memory_space<any>>, %arg2: memref<8x32xf32, #tpu.memory_space<any>>, %arg3: memref<16x32xf32, #tpu.memory_space<any>>, %arg4: memref<2x!tpu.dma_semaphore, #tpu.memory_space<semaphore_mem>>) attributes {dimension_semantics = [], scalar_prefetch = 0 : i64, scratch_operands = 1 : i64, tpu.core_type = #tpu.core_type<tc>} {
    %c0_i32 = arith.constant 0 : i32
    %0 = tpu.memref_slice %arg4[%c0_i32] : memref<2x!tpu.dma_semaphore, #tpu.memory_space<semaphore_mem>> -> memref<1x!tpu.dma_semaphore, #tpu.memory_space<semaphore_mem>>
    %1 = tpu.memref_squeeze %0 : memref<1x!tpu.dma_semaphore, #tpu.memory_space<semaphore_mem>> -> memref<!tpu.dma_semaphore, #tpu.memory_space<semaphore_mem>>
    tpu.enqueue_dma source(%arg0 : memref<8x32xf32, #tpu.memory_space<any>>) target(%arg2 : memref<8x32xf32, #tpu.memory_space<any>>) target_semaphore(%1 : memref<!tpu.dma_semaphore, #tpu.memory_space<semaphore_mem>>)
    %c1_i32 = arith.constant 1 : i32
    %2 = tpu.memref_slice %arg4[%c1_i32] : memref<2x!tpu.dma_semaphore, #tpu.memory_space<semaphore_mem>> -> memref<1x!tpu.dma_semaphore, #tpu.memory_space<semaphore_mem>>
    %3 = tpu.memref_squeeze %2 : memref<1x!tpu.dma_semaphore, #tpu.memory_space<semaphore_mem>> -> memref<!tpu.dma_semaphore, #tpu.memory_space<semaphore_mem>>
    tpu.enqueue_dma source(%arg1 : memref<16x32xf32, #tpu.memory_space<any>>) target(%arg3 : memref<16x32xf32, #tpu.memory_space<any>>) target_semaphore(%3 : memref<!tpu.dma_semaphore, #tpu.memory_space<semaphore_mem>>)
    %c0_i32_0 = arith.constant 0 : i32
    %4 = tpu.memref_slice %arg4[%c0_i32_0] : memref<2x!tpu.dma_semaphore, #tpu.memory_space<semaphore_mem>> -> memref<1x!tpu.dma_semaphore, #tpu.memory_space<semaphore_mem>>
    %5 = tpu.memref_squeeze %4 : memref<1x!tpu.dma_semaphore, #tpu.memory_space<semaphore_mem>> -> memref<!tpu.dma_semaphore, #tpu.memory_space<semaphore_mem>>
    tpu.wait_dma2 semaphore(%5 : memref<!tpu.dma_semaphore, #tpu.memory_space<semaphore_mem>>) src(%arg0 : memref<8x32xf32, #tpu.memory_space<any>>) dst(%arg2 : memref<8x32xf32, #tpu.memory_space<any>>)
    %c1_i32_1 = arith.constant 1 : i32
    %6 = tpu.memref_slice %arg4[%c1_i32_1] : memref<2x!tpu.dma_semaphore, #tpu.memory_space<semaphore_mem>> -> memref<1x!tpu.dma_semaphore, #tpu.memory_space<semaphore_mem>>
    %7 = tpu.memref_squeeze %6 : memref<1x!tpu.dma_semaphore, #tpu.memory_space<semaphore_mem>> -> memref<!tpu.dma_semaphore, #tpu.memory_space<semaphore_mem>>
    tpu.wait_dma2 semaphore(%7 : memref<!tpu.dma_semaphore, #tpu.memory_space<semaphore_mem>>) src(%arg1 : memref<16x32xf32, #tpu.memory_space<any>>) dst(%arg3 : memref<16x32xf32, #tpu.memory_space<any>>)
    return
  }
}

</mosaic_0001>

<bundles_post_ra>
// kernel: tpu_custom_call.1
= control target key start
LH: loop header
LB: loop body
LE: loop exit
PB: predicated region body
PF: predicated region fallthrough
CT: control target
= control target key end

     0   :  { %s53_s12 = smov [#allocation2]   ;;  %s54_s13 = smov 131072   ;;  %s89_s0 = inlined_call_operand.hbm [shape: f32[8,32], index: 0, kind: input, shape index: {}]   ;;  %s90_s2 = inlined_call_operand.hbm [shape: f32[8,32], index: 2, kind: output, shape index: {0}]   ;;  %s91_s1 = inlined_call_operand.hbm [shape: f32[16,32], index: 1, kind: input, shape index: {}]   ;;  %s92_s3 = inlined_call_operand.hbm [shape: f32[16,32], index: 3, kind: output, shape index: {1}]  }
   0x1   :  { %s55_s14 = smov 0   ;;  %s56_s19 = smov [#allocation2 + $0x1]  }
   0x2   :  { %15 = dma.general %s89_s0, 128, %s90_s2, %s53_s12, %s54_s13, [#allocation4], %s55_s14, 0  }
   0x3   :  { %23 = dma.general %s91_s1, 256, %s92_s3, %s56_s19, %s54_s13, [#allocation6], %s55_s14, 0  }
   0x4   :  { %49 = dma.done.wait [#allocation2], 128 }
   0x5   :  { %50 = vsyncadd [#allocation2], 4294967168 }
   0x6   :  { %51 = dma.done.wait [#allocation2 + $0x1], 256 }
   0x7   :  { %52 = vsyncadd [#allocation2 + $0x1], 4294967040 }
   0x8   :  { %30 = vsyncmov [#allocation2] }
   0xb   :  { %s31_s24 = vpop.sfrf %30 }
   0xc   :  { %p43_p0 = scmp.ne.s32.totalorder %s31_s24, 0 }
   0xe   :  { %35 = shalt.err (%p43_p0)  }
   0xf   :  { %37 = vsyncmov [#allocation2 + $0x1] }
  0x12   :  { %s38_s25 = vpop.sfrf %37 }
  0x13   :  { %p44_p1 = scmp.ne.s32.totalorder %s38_s25, 0 }
  0x15   :  { %42 = shalt.err (%p44_p1)  }

</bundles_post_ra>
